<compile_context>
chip_gen: v7x
topology: tpu7x:2x2x1
jax: 0.10.0
libtpu: 0.0.40
codegen_flags: <defaults>
</compile_context>

<pallas_src>
import jax
import jax.numpy as jnp
import numpy as np
from jax import lax
from jax.experimental import pallas as pl
from jax.experimental.pallas import tpu as pltpu


def _round_up(n, m):
    return ((n + m - 1) // m) * m


def _cdiv(a, b):
    return (a + b - 1) // b


def _choose_batch_tile(batch, max_tile=8192):
    """Large lane-aligned batch tiles with >=2 grid steps (v7x megacore)."""
    bp = _round_up(max(batch, 1), 128)
    if bp <= 128:
        return 128, 128
    n_steps = max(2, _cdiv(bp, max_tile))
    tb = _round_up(_cdiv(bp, n_steps), 128)
    return tb, tb * n_steps


def _hard_gates(mask):
    """Forward value of the straight-through hard channel gate.

    argmax(softmax(m, 0), 0) == argmax(m, 0) (softmax is monotone) and
    "(hard - p) + p" == hard in a forward-only pass, so the gate reduces to
    raw-logit comparisons with argmax first-max tie-breaking.

    mask: (3, F) logits -> (active, deactive, program) one-hot rows, each (F,).
    """
    m0, m1, m2 = mask[0], mask[1], mask[2]
    h0 = (m0 >= m1) & (m0 >= m2)
    h1 = jnp.logical_not(h0) & (m1 >= m2)
    h2 = jnp.logical_not(h0) & jnp.logical_not(h1)
    d = mask.dtype
    return h0.astype(d), h1.astype(d), h2.astype(d)


def masked_mlp_kernel(x_ref, w0_ref, w1_ref, w2_ref, side_ref, out_ref):
    """Per batch-tile body.

    x arrives in natural (TB, F_IN) layout (optionally bf16); all matmuls land
    in the transposed (features-on-sublanes, batch-on-lanes) layout so every
    elementwise / EUP op and the final store are lane-dense.
    """
    hidden = w1_ref.shape[0]
    f_out = out_ref.shape[0]

    # Upcast once (bf16 streaming halves HBM bytes; elementwise stays f32).
    x = x_ref[...].astype(jnp.float32)                       # (TB, F_IN)
    side = side_ref[...]                                     # (rows, 9) f32

    b0 = side[:hidden, 0:1]
    g1a, g1p = side[:hidden, 1:2], side[:hidden, 2:3]        # ReLU  [a, p]
    b1 = side[:hidden, 3:4]
    g3ad, g3p = side[:hidden, 4:5], side[:hidden, 5:6]       # Tanh  [a-d, p]
    b2 = side[:f_out, 6:7]
    g5a, g5p = side[:f_out, 7:8], side[:f_out, 8:9]          # Sigm  [a, p]

    # Linear 0 (input gate pre-folded): contract the shared feature axis so the
    # result is (hidden, TB) — batch on lanes — without a wrapper transpose.
    h = lax.dot_general(w0_ref[...], x, (((1,), (1,)), ((), ())),
                        preferred_element_type=jnp.float32) + b0
    # Masked ReLU:  a * pre_act + p * relu(pre_act)   (deactive term == 0)
    x1 = g1a * h + g1p * jnp.maximum(h, 0.0)

    # Linear 2 + masked Tanh:  (a - d) + p * tanh(h)
    h = jnp.dot(w1_ref[...], x1, preferred_element_type=jnp.float32) + b1
    x2 = g3ad + g3p * jnp.tanh(h)

    # Linear 4 + masked Sigmoid:  a + p * sigmoid(h)
    h = jnp.dot(w2_ref[...], x2, preferred_element_type=jnp.float32) + b2
    out_ref[...] = (g5a + g5p * jax.nn.sigmoid(h)).astype(out_ref.dtype)


def network_masker_forward(x, mask_in, w0, b0, m1, w1, b1, m3, w2, b2, m5,
                           *, max_block_batch=8192):
    """NetworkMasker.forward for the synthesized Sequential above.

    x: (B, F_IN) in f32 or bf16 (bf16 recommended on v6e/v7x — halves HBM
    traffic of this memory-bound kernel); masks: (3, F); weights [in, out];
    biases 1-D. Returns (B, F_OUT) float32.
    """
    f32 = jnp.float32
    B, f_in = x.shape
    hidden = w0.shape[1]
    f_out = w2.shape[1]

    # ---- batch-independent mask preprocessing (O(F), hoisted out of the kernel) ----
    a_in, _, p_in = _hard_gates(jnp.asarray(mask_in, f32))   # (f_in,)
    a1, _, p1 = _hard_gates(jnp.asarray(m1, f32))            # (hidden,)
    a3, d3, p3 = _hard_gates(jnp.asarray(m3, f32))           # (hidden,)
    a5, _, p5 = _hard_gates(jnp.asarray(m5, f32))            # (f_out,)

    w0 = jnp.asarray(w0, f32); w1 = jnp.asarray(w1, f32); w2 = jnp.asarray(w2, f32)
    b0 = jnp.asarray(b0, f32); b1 = jnp.asarray(b1, f32); b2 = jnp.asarray(b2, f32)

    # Fold the input gate into Linear 0:
    #   (p_in*x + a_in) @ W0 + b0 == x @ (p_in[:, None] * W0) + (a_in @ W0 + b0)
    w0f = p_in[:, None] * w0                                  # (f_in, hidden)
    b0f = a_in @ w0 + b0                                      # (hidden,)

    # Transposed weights for the features-on-sublanes internal layout.
    w0t = w0f.T                                               # (hidden, f_in)
    w1t = w1.T                                                # (hidden, hidden)
    w2t = w2.T                                                # (f_out, hidden)

    # Pack biases + gate coefficient columns into ONE small VMEM-resident table.
    rows = max(hidden, f_out)
    side = jnp.zeros((rows, 9), f32)
    side = side.at[:hidden, 0].set(b0f)
    side = side.at[:hidden, 1].set(a1)
    side = side.at[:hidden, 2].set(p1)
    side = side.at[:hidden, 3].set(b1)
    side = side.at[:hidden, 4].set(a3 - d3)
    side = side.at[:hidden, 5].set(p3)
    side = side.at[:f_out, 6].set(b2)
    side = side.at[:f_out, 7].set(a5)
    side = side.at[:f_out, 8].set(p5)

    # Batch tiling: big tiles (amortize ~0.35us/step overhead), >=2 grid steps.
    tb, bp = _choose_batch_tile(B, max_block_batch)
    xp = x if bp == B else jnp.pad(x, ((0, bp - B), (0, 0)))  # single pass, kernel layout

    const = lambda shape: pl.BlockSpec(shape, lambda i: (0, 0))  # VMEM-resident

    out_t = pl.pallas_call(
        masked_mlp_kernel,
        out_shape=jax.ShapeDtypeStruct((f_out, bp), f32),
        grid=(bp // tb,),
        in_specs=[
            pl.BlockSpec((tb, f_in), lambda i: (i, 0)),       # natural-layout x tile
            const((hidden, f_in)),
            const((hidden, hidden)),
            const((f_out, hidden)),
            const((rows, 9)),
        ],
        out_specs=pl.BlockSpec((f_out, tb), lambda i: (0, i)),  # lane-dense output
        compiler_params=pltpu.CompilerParams(
            dimension_semantics=("parallel",)),
    )(xp, w0t, w1t, w2t, side)

    # Only the tiny (f_out, B) result is relaid out to the (B, f_out) contract.
    return out_t.T[:B]


def _reference(x, mask_in, w0, b0, m1, w1, b1, m3, w2, b2, m5):
    """Pure-JAX mirror of the PyTorch NetworkMasker.forward (natural [B, F] layout)."""
    def gate(mask):
        probs = jax.nn.softmax(mask, axis=0)
        idx = jnp.argmax(probs, axis=0)
        hard = jax.nn.one_hot(idx, 3, axis=0, dtype=probs.dtype)
        m = hard - probs + probs
        return m[0], m[1], m[2]

    pa, pd, pp = gate(mask_in)
    x = pa * jnp.ones_like(x) + pd * jnp.zeros_like(x) + pp * x

    h = x @ w0 + b0                                   # Linear 0
    pa, pd, pp = gate(m1)                             # ReLU gate: active = pre-act
    x = pa * h + pd * jnp.zeros_like(h) + pp * jnp.maximum(h, 0.0)

    h = x @ w1 + b1                                   # Linear 2
    pa, pd, pp = gate(m3)                             # Tanh gate: active=+1, deact=-1
    x = pa * jnp.ones_like(h) + pd * (-jnp.ones_like(h)) + pp * jnp.tanh(h)

    h = x @ w2 + b2                                   # Linear 4
    pa, pd, pp = gate(m5)                             # Sigmoid gate: active=1, deact=0
    return pa * jnp.ones_like(h) + pd * jnp.zeros_like(h) + pp * jax.nn.sigmoid(h)


if __name__ == "__main__":
    B, F_IN, H, F_OUT = 512, 16, 32, 8
    key = jax.random.PRNGKey(0)
    ks = jax.random.split(key, 11)

    # Stream activations as bf16 (recommended path on v6e/v7x; legal everywhere).
    x = jax.random.normal(ks[0], (B, F_IN), dtype=jnp.float32).astype(jnp.bfloat16)

    w0 = jax.random.normal(ks[1], (F_IN, H), jnp.float32) * 0.1
    b0 = jax.random.normal(ks[2], (H,), jnp.float32) * 0.1
    w1 = jax.random.normal(ks[3], (H, H), jnp.float32) * 0.1
    b1 = jax.random.normal(ks[4], (H,), jnp.float32) * 0.1
    w2 = jax.random.normal(ks[5], (H, F_OUT), jnp.float32) * 0.1
    b2 = jax.random.normal(ks[6], (F_OUT,), jnp.float32) * 0.1

    mask_in = jax.random.normal(ks[7], (3, F_IN), jnp.float32)
    m1 = jax.random.normal(ks[8], (3, H), jnp.float32)
    m3 = jax.random.normal(ks[9], (3, H), jnp.float32)
    m5 = jax.random.normal(ks[10], (3, F_OUT), jnp.float32)

    out = network_masker_forward(x, mask_in, w0, b0, m1, w1, b1, m3, w2, b2, m5)
    out = jax.block_until_ready(out)
    assert out.shape == (B, F_OUT)

    # Reference consumes the same bf16-rounded input values, computed in f32.
    ref = _reference(x.astype(jnp.float32), mask_in, w0, b0, m1, w1, b1, m3, w2, b2, m5)
    # Tolerance absorbs f32-dot pass-count differences between the in-kernel MXU
    # matmuls and XLA's default f32 dot precision on TPU.
    np.testing.assert_allclose(np.asarray(out), np.asarray(ref),
                               rtol=5e-3, atol=5e-3)

    print("KERNEL_OK")
</pallas_src>

<mosaic_0001>
module attributes {stable_mosaic.version = 11 : i64} {
  func.func @masked_mlp_kernel(%arg0: i32, %arg1: memref<256x16xbf16, #tpu.memory_space<vmem>>, %arg2: memref<32x16xf32, #tpu.memory_space<vmem>>, %arg3: memref<32x32xf32, #tpu.memory_space<vmem>>, %arg4: memref<8x32xf32, #tpu.memory_space<vmem>>, %arg5: memref<32x9xf32, #tpu.memory_space<vmem>>, %arg6: memref<8x256xf32, #tpu.memory_space<vmem>>) attributes {dimension_semantics = [#tpu.dimension_semantics<parallel>], iteration_bounds = array<i64: 2>, scalar_prefetch = 0 : i64, scratch_operands = 0 : i64, tpu.core_type = #tpu.core_type<tc>, window_params = [{transform_indices = @transform_0, window_bounds = array<i64: 256, 16>}, {pipeline_mode = #tpu.pipeline_mode<synchronous>, transform_indices = @transform_1, window_bounds = array<i64: 32, 16>}, {pipeline_mode = #tpu.pipeline_mode<synchronous>, transform_indices = @transform_2, window_bounds = array<i64: 32, 32>}, {pipeline_mode = #tpu.pipeline_mode<synchronous>, transform_indices = @transform_3, window_bounds = array<i64: 8, 32>}, {pipeline_mode = #tpu.pipeline_mode<synchronous>, transform_indices = @transform_4, window_bounds = array<i64: 32, 9>}, {transform_indices = @transform_5, window_bounds = array<i64: 8, 256>}]} {
    %c0 = arith.constant 0 : index
    %c0_0 = arith.constant 0 : index
    %0 = vector.load %arg1[%c0, %c0_0] : memref<256x16xbf16, #tpu.memory_space<vmem>>, vector<256x16xbf16>
    %1 = arith.extf %0 : vector<256x16xbf16> to vector<256x16xf32>
    %c0_1 = arith.constant 0 : index
    %c0_2 = arith.constant 0 : index
    %2 = vector.load %arg5[%c0_1, %c0_2] : memref<32x9xf32, #tpu.memory_space<vmem>>, vector<32x9xf32>
    %3 = vector.extract_strided_slice %2 {offsets = [0, 0], sizes = [32, 1], strides = [1, 1]} : vector<32x9xf32> to vector<32x1xf32>
    %4 = vector.extract_strided_slice %2 {offsets = [0, 1], sizes = [32, 1], strides = [1, 1]} : vector<32x9xf32> to vector<32x1xf32>
    %5 = vector.extract_strided_slice %2 {offsets = [0, 2], sizes = [32, 1], strides = [1, 1]} : vector<32x9xf32> to vector<32x1xf32>
    %6 = vector.extract_strided_slice %2 {offsets = [0, 3], sizes = [32, 1], strides = [1, 1]} : vector<32x9xf32> to vector<32x1xf32>
    %7 = vector.extract_strided_slice %2 {offsets = [0, 4], sizes = [32, 1], strides = [1, 1]} : vector<32x9xf32> to vector<32x1xf32>
    %8 = vector.extract_strided_slice %2 {offsets = [0, 5], sizes = [32, 1], strides = [1, 1]} : vector<32x9xf32> to vector<32x1xf32>
    %9 = vector.extract_strided_slice %2 {offsets = [0, 6], sizes = [8, 1], strides = [1, 1]} : vector<32x9xf32> to vector<8x1xf32>
    %10 = vector.extract_strided_slice %2 {offsets = [0, 7], sizes = [8, 1], strides = [1, 1]} : vector<32x9xf32> to vector<8x1xf32>
    %11 = vector.extract_strided_slice %2 {offsets = [0, 8], sizes = [8, 1], strides = [1, 1]} : vector<32x9xf32> to vector<8x1xf32>
    %c0_3 = arith.constant 0 : index
    %c0_4 = arith.constant 0 : index
    %12 = vector.load %arg2[%c0_3, %c0_4] : memref<32x16xf32, #tpu.memory_space<vmem>>, vector<32x16xf32>
    %cst = arith.constant dense<0.000000e+00> : vector<32x256xf32>
    %13 = tpu.matmul %12, %1, %cst {dimension_numbers = #tpu.dot_dimension_numbers<[1], [1], [0], [0], [0, 0, 1, 0], [], []>} : vector<32x16xf32>, vector<256x16xf32>, vector<32x256xf32> -> vector<32x256xf32>
    %14 = vector.broadcast %3 : vector<32x1xf32> to vector<32x256xf32>
    %15 = arith.addf %13, %14 : vector<32x256xf32>
    %16 = vector.broadcast %4 : vector<32x1xf32> to vector<32x256xf32>
    %17 = arith.mulf %16, %15 : vector<32x256xf32>
    %cst_5 = arith.constant 0.000000e+00 : f32
    %18 = vector.broadcast %cst_5 : f32 to vector<32x256xf32>
    %19 = arith.maximumf %15, %18 : vector<32x256xf32>
    %20 = vector.broadcast %5 : vector<32x1xf32> to vector<32x256xf32>
    %21 = arith.mulf %20, %19 : vector<32x256xf32>
    %22 = arith.addf %17, %21 : vector<32x256xf32>
    %c0_6 = arith.constant 0 : index
    %c0_7 = arith.constant 0 : index
    %23 = vector.load %arg3[%c0_6, %c0_7] : memref<32x32xf32, #tpu.memory_space<vmem>>, vector<32x32xf32>
    %cst_8 = arith.constant dense<0.000000e+00> : vector<32x256xf32>
    %24 = tpu.matmul %23, %22, %cst_8 {dimension_numbers = #tpu.dot_dimension_numbers<[1], [0], [0], [1], [0, 0, 1, 1], [], []>} : vector<32x32xf32>, vector<32x256xf32>, vector<32x256xf32> -> vector<32x256xf32>
    %25 = vector.broadcast %6 : vector<32x1xf32> to vector<32x256xf32>
    %26 = arith.addf %24, %25 : vector<32x256xf32>
    %27 = math.tanh %26 : vector<32x256xf32>
    %28 = vector.broadcast %8 : vector<32x1xf32> to vector<32x256xf32>
    %29 = arith.mulf %28, %27 : vector<32x256xf32>
    %30 = vector.broadcast %7 : vector<32x1xf32> to vector<32x256xf32>
    %31 = arith.addf %30, %29 : vector<32x256xf32>
    %c0_9 = arith.constant 0 : index
    %c0_10 = arith.constant 0 : index
    %32 = vector.load %arg4[%c0_9, %c0_10] : memref<8x32xf32, #tpu.memory_space<vmem>>, vector<8x32xf32>
    %cst_11 = arith.constant dense<0.000000e+00> : vector<8x256xf32>
    %33 = tpu.matmul %32, %31, %cst_11 {dimension_numbers = #tpu.dot_dimension_numbers<[1], [0], [0], [1], [0, 0, 1, 1], [], []>} : vector<8x32xf32>, vector<32x256xf32>, vector<8x256xf32> -> vector<8x256xf32>
    %34 = vector.broadcast %9 : vector<8x1xf32> to vector<8x256xf32>
    %35 = arith.addf %33, %34 : vector<8x256xf32>
    %36 = arith.negf %35 : vector<8x256xf32>
    %37 = math.exp %36 : vector<8x256xf32>
    %cst_12 = arith.constant 1.000000e+00 : f32
    %38 = vector.broadcast %cst_12 : f32 to vector<8x256xf32>
    %39 = arith.addf %38, %37 : vector<8x256xf32>
    %40 = arith.divf %38, %39 : vector<8x256xf32>
    %41 = vector.broadcast %11 : vector<8x1xf32> to vector<8x256xf32>
    %42 = arith.mulf %41, %40 : vector<8x256xf32>
    %43 = vector.broadcast %10 : vector<8x1xf32> to vector<8x256xf32>
    %44 = arith.addf %43, %42 : vector<8x256xf32>
    %c0_13 = arith.constant 0 : index
    %c0_14 = arith.constant 0 : index
    %45 = vector.load %arg6[%c0_13, %c0_14] : memref<8x256xf32, #tpu.memory_space<vmem>>, vector<8x256xf32>
    tpu.vector_store %arg6[%c0_13, %c0_14], %44 {strides = array<i32>} : memref<8x256xf32, #tpu.memory_space<vmem>>, vector<8x256xf32>,
    return
  }
  func.func @transform_0(%arg0: i32) -> (i32, i32) {
    %c0_i32 = arith.constant 0 : i32
    %c0_i32_0 = arith.constant 0 : i32
    return %arg0, %c0_i32 : i32, i32
  }
  func.func @transform_1(%arg0: i32) -> (i32, i32) {
    %c0_i32 = arith.constant 0 : i32
    %c0_i32_0 = arith.constant 0 : i32
    %c0_i32_1 = arith.constant 0 : i32
    return %c0_i32, %c0_i32_0 : i32, i32
  }
  func.func @transform_2(%arg0: i32) -> (i32, i32) {
    %c0_i32 = arith.constant 0 : i32
    %c0_i32_0 = arith.constant 0 : i32
    %c0_i32_1 = arith.constant 0 : i32
    return %c0_i32, %c0_i32_0 : i32, i32
  }
  func.func @transform_3(%arg0: i32) -> (i32, i32) {
    %c0_i32 = arith.constant 0 : i32
    %c0_i32_0 = arith.constant 0 : i32
    %c0_i32_1 = arith.constant 0 : i32
    return %c0_i32, %c0_i32_0 : i32, i32
  }
  func.func @transform_4(%arg0: i32) -> (i32, i32) {
    %c0_i32 = arith.constant 0 : i32
    %c0_i32_0 = arith.constant 0 : i32
    %c0_i32_1 = arith.constant 0 : i32
    return %c0_i32, %c0_i32_0 : i32, i32
  }
  func.func @transform_5(%arg0: i32) -> (i32, i32) {
    %c0_i32 = arith.constant 0 : i32
    %c0_i32_0 = arith.constant 0 : i32
    return %c0_i32, %arg0 : i32, i32
  }
}

</mosaic_0001>

<bundles_post_ra>
// kernel: tpu_custom_call.1
= control target key start
LH: loop header
LB: loop body
LE: loop exit
PB: predicated region body
PF: predicated region fallthrough
CT: control target
= control target key end

     0   :  { %10 = vsyncpa [#allocation3], 0  ;;  %s1625_s0 = inlined_call_operand.vmem [shape: bf16[512,16], index: 0, kind: input, shape index: {}]   ;;  %s1626_s1 = inlined_call_operand.vmem [shape: f32[32,16], index: 1, kind: input, shape index: {}]   ;;  %s1627_s2 = inlined_call_operand.vmem [shape: f32[32,32], index: 2, kind: input, shape index: {}]   ;;  %s1628_s3 = inlined_call_operand.vmem [shape: f32[8,32], index: 3, kind: input, shape index: {}]   ;;  %s1629_s4 = inlined_call_operand.vmem [shape: f32[32,9], index: 4, kind: input, shape index: {}]   ;;  %s1630_s5 = inlined_call_operand.hbm [shape: f32[8,512], index: 5, kind: output, shape index: {}]  }
   0x1   :  { %12 = vsyncpa [#allocation3 + $0x1], 0  ;;  %s1374_s18 = smov 0   ;;  %s1376_s19 = smov 0  }
   0x2   :  { %s1378_s20 = smov 0   ;;  %s1380_s21 = smov 0  }
   0x3 LB: > { %s1395_s22 = sadd.s32 4294967295, %s1331_s21   ;;  %s937_s23 = sadd.s32 4294967294, %s1331_s21   ;;  %s1331_s21 = sphi %s1380_s21, %s1638_s21   ;;  %s1327_s20 = sphi %s1378_s20, %s1637_s20   ;;  %s1323_s19 = sphi %s1376_s19, %s1636_s19   ;;  %s1319_s18 = sphi %s1374_s18, %s1635_s18  }
   0x4   : > { %s1399_s24 = sadd.s32 1, %s1331_s21   ;;  %s135_s25 = sadd.s32 1, %s1327_s20 }
   0x5   : > { %s132_s26 = ssub.s32 %s1331_s21, %s1399_s24  ;;  %p145_p0 = scmp.ne.s32.totalorder %s1327_s20, %s1323_s19 }
   0x6   : > { %p133_p1 = scmp.eq.s32.totalorder %s132_s26, 0  ;;  %p146_p2 = scmp.eq.s32.totalorder %s1395_s22, 1 }
   0x7   : > { %p151_p3 = scmp.ne.s32.totalorder %s1323_s19, %s1319_s18  ;;  %p152_p4 = scmp.eq.s32.totalorder %s937_s23, 1 }
   0x8   : > { %s1410_s27 = scalar_select %p133_p1, %s1327_s20, %s135_s25  }
   0x9   : > { %p1412_p5 = por %p146_p2, %p145_p0  ;;  %p1416_p6 = por %p152_p4, %p151_p3 }
   0xa   : > { %p940_p7 = scmp.ge.s32.totalorder %s1331_s21, 1  ;;  %p191_p8 = scmp.lt.s32.totalorder %s1331_s21, 3 }
   0xc   : > { %p192_p9 = pnand %p940_p7, %p191_p8 }
   0xd   : > { %s942_s30 = sshll.u32 (!%p192_p9), %s1395_s22, 5  ;;  %vm318_vm0 = vcmask (!%p192_p9), 130048   ;;  %v1426_v0 = vld [vmem:[%s1626_s1] sm:$0xff] (!%p192_p9)  ;;  %v1333_v1 = vmov (!%p192_p9), 0   ;;  %v1433_v2 = vld [vmem:[%s1629_s4 + $0x10] sm:$0xff] (!%p192_p9)  ;;  %v1444_v4 = vld [vmem:[%s1629_s4 + $0x18] sm:$0xff] (!%p192_p9) }
   0xe   : > { %195 = sbr.rel (%p192_p9) target bundleno = 835 (0x343), region = 40  ;;  %p220_p10 = scmp.lt.s32.totalorder (!%p192_p9), %s942_s30, 63  ;;  %1104 = vmatprep.mubr.msk.f32.mxu0 (!%p192_p9), %vm318_vm0, %v1426_v0  ;;  %1226 = vset.pattern.permute.xlu1 (!%p192_p9), %v1333_v1  ;;  %v1439_v3 = vld [vmem:[%s1629_s4] sm:$0xff] (!%p192_p9)  ;;  %vm1449_vm1 = vmpackc.low (!%p192_p9), %vm318_vm0, %vm318_vm0  ;;  %v1462_v6 = vld [vmem:[%s1629_s4 + $0x8] sm:$0xff] (!%p192_p9)  ;;  %v1334_v10 = vmov (!%p192_p9), 1   ;;  %v1335_v13 = vmov (!%p192_p9), 2  }
   0xf   : > { %310 = vperm.xlu1 (!%p192_p9), %1226, %v1433_v2   ;;  %1225 = vset.pattern.permute.xlu0 (!%p192_p9), %v1333_v1  ;;  %v295_v25 = vld [vmem:[%s1626_s1 + $0x8] sm:$0xff] (!%p192_p9)  ;;  %v296_v26 = vld [vmem:[%s1626_s1 + $0x10] sm:$0xff] (!%p192_p9)  ;;  %v297_v27 = vld [vmem:[%s1626_s1 + $0x18] sm:$0xff] (!%p192_p9)  ;;  %v1336_v28 = vmov (!%p192_p9), 0.0   ;;  %v1337_v29 = vmov (!%p192_p9), 3   ;;  %v1338_v30 = vmov (!%p192_p9), 5  }
  0x10   : > { %300 = vperm.xlu0 (!%p192_p9), %1225, %v1439_v3   ;;  %677 = vmatprep.mubr.f32.mxu1 (!%p192_p9), %v1336_v28  ;;  %v1339_v31 = vmov (!%p192_p9), 4   ;;  %vm600_vm2 = vcmask (!%p192_p9), 261120   ;;  %s216_s26 = sand.u32 (!%p192_p9), 1, %s1323_s19   ;;  %s992_s6 = sshll.u32 (!%p192_p9), %s1395_s22, 8 }
  0x11   : > { %s1583_s11 = scalar_lea.hbm (!%p192_p9), %s1630_s5, %s992_s6  ;;  %s864_s12 = scalar_lea.sflag (!%p192_p9), [#allocation3], %s216_s26 }
  0x12   : > { %s1343_s22 = smov (!%p192_p9), [#allocation2]  }
  0x13   : > { %315 = vperm.xlu1 (!%p192_p9), %1226, %v1444_v4  }
  0x14   : > { %305 = vperm.xlu0 (!%p192_p9), %1225, %v1462_v6  }
  0x15   : > { %s1640_s30 = smov (!%p220_p10, %s942_s30), 63 }
  0x16   : > { %s943_s14 = sshll.u32 %s1640_s30, 2  ;;  %s941_s30 = sshll.u32 %s216_s26, 4 }
  0x17   : > { %s1456_s17 = scalar_lea.vmem %s1625_s0, %s943_s14  ;;  %1228 = vset.pattern.permute.xlu1 %v1334_v10  ;;  %s218_s7 = scalar_lea.vmem [#allocation2], %s941_s30 }
  0x18   : > { %v1064_v7 = vld [vmem:[%s1456_s17 + $0x40] sm:$0xff]   ;;  %v1065_v9 = vld [vmem:[%s1456_s17 + $0x48] sm:$0xff]   ;;  %521 = vperm.xlu1 %1228, %v1462_v6   ;;  %1227 = vset.pattern.permute.xlu0 %v1334_v10  ;;  %v1066_v12 = vld [vmem:[%s1456_s17 + $0x50] sm:$0xff]   ;;  %s878_s8 = sshll.u32 %s218_s7, 4  ;;  %s1273_s14 = sshll.u32 %s1343_s22, 4  ;;  %s1585_s8 = int_to_ptr.vmem [resolvable:$true] %s878_s8  ;;  %s1274_s14 = int_to_ptr.vmem [resolvable:$false] %s1273_s14 }
  0x19   : > { %v994_v8 = vld [vmem:[%s1456_s17] sm:$0xff]   ;;  %1114 = vmatprep.subr.msk.bf16.mxu0 %vm1449_vm1, %v1064_v7  ;;  %517 = vperm.xlu0 %1227, %v1439_v3   ;;  %v1057_v11 = vld [vmem:[%s1456_s17 + $0x8] sm:$0xff]   ;;  %v1058_v14 = vld [vmem:[%s1456_s17 + $0x10] sm:$0xff]   ;;  %s1269_s13 = scalar_lea.vmem %s1585_s8, 256  ;;  %s1275_s15 = scalar_lea.vmem %s1274_s14, 512 }
  0x1a   : > { %1117 = vmatpush3.bf16.xpose.msk.msra.mxu0 %vm1449_vm1, %v994_v8  ;;  %v1067_v15 = vld [vmem:[%s1456_s17 + $0x58] sm:$0xff]   ;;  %v1068_v17 = vld [vmem:[%s1456_s17 + $0x60] sm:$0xff]   ;;  %v1069_v19 = vld [vmem:[%s1456_s17 + $0x68] sm:$0xff]   ;;  %p1270_p11 = scmp.ne.s32.totalorder %s1585_s8, %s1269_s13  ;;  %p1276_p0 = scmp.lt.s32.totalorder %s1585_s8, %s1274_s14 }
  0x1b   : > { %1120 = vmatprep.subr.msk.bf16.mxu0 %vm1449_vm1, %v1065_v9  ;;  %v1059_v16 = vld [vmem:[%s1456_s17 + $0x18] sm:$0xff]   ;;  %v1060_v18 = vld [vmem:[%s1456_s17 + $0x20] sm:$0xff]   ;;  %v1061_v20 = vld [vmem:[%s1456_s17 + $0x28] sm:$0xff]   ;;  %p1277_p1 = scmp.lt.s32.totalorder %s1275_s15, %s1269_s13 }
  0x1c   : > { %1229 = vset.pattern.permute.xlu1 %v1335_v13  ;;  %v1070_v21 = vld [vmem:[%s1456_s17 + $0x70] sm:$0xff]   ;;  %v1071_v23 = vld [vmem:[%s1456_s17 + $0x78] sm:$0xff]   ;;  %p1271_p12 = pnand %p1270_p11, %p1412_p5 }
  0x1d   : > { %549 = vperm.xlu1 %1229, %v1439_v3   ;;  %1230 = vset.pattern.permute.xlu0 %v1335_v13  ;;  %v1062_v22 = vld [vmem:[%s1456_s17 + $0x30] sm:$0xff]   ;;  %v1063_v24 = vld [vmem:[%s1456_s17 + $0x38] sm:$0xff]   ;;  %p1278_p2 = por %p1277_p1, %p1276_p0 }
  0x1e   : > { %553 = vperm.xlu0 %1230, %v1462_v6   ;;  %p1272_p13 = pneg %p1271_p12 }
  0x20   : > { %p1279_p3 = pnand %p1278_p2, %p1272_p13 }
  0x21   : > { %1231 = vset.pattern.permute.xlu1 %v1334_v10 }
  0x22   : > { %1123 = vmatpush3.bf16.xpose.msk.msra.mxu0 %vm1449_vm1, %v1057_v11  ;;  %525 = vperm.xlu1 %1231, %v1433_v2  }
  0x23   : > { %1126 = vmatprep.subr.msk.bf16.mxu0 %vm1449_vm1, %v1066_v12  ;;  %557 = vperm.xlu0 %1230, %v1433_v2  }
  0x26   : > { %529 = vperm.xlu1 %1231, %v1444_v4  }
  0x27   : > { %1233 = vset.pattern.permute.xlu0 %v1337_v29 }
  0x28   : > { %585 = vperm.xlu0 %1233, %v1439_v3  }
  0x2a   : > { %1129 = vmatpush3.bf16.xpose.msk.msra.mxu0 %vm1449_vm1, %v1058_v14  ;;  %1232 = vset.pattern.permute.xlu1 %v1335_v13 }
  0x2b   : > { %1132 = vmatprep.subr.msk.bf16.mxu0 %vm1449_vm1, %v1067_v15  ;;  %561 = vperm.xlu1 %1232, %v1444_v4  }
  0x2c   : > { %597 = vperm.xlu0 %1233, %v1444_v4  }
  0x2f   : > { %1234 = vset.pattern.permute.xlu1 %v1337_v29 }
  0x30   : > { %589 = vperm.xlu1 %1234, %v1462_v6   ;;  %1236 = vset.pattern.permute.xlu0 %v1338_v30 }
  0x31   : > { %715 = vperm.xlu0 %1236, %v1462_v6  }
  0x32   : > { %1135 = vmatpush3.bf16.xpose.msk.msra.mxu0 %vm1449_vm1, %v1059_v16 }
  0x33   : > { %1138 = vmatprep.subr.msk.bf16.mxu0 %vm1449_vm1, %v1068_v17 }
  0x34   : > { %593 = vperm.xlu1 %1234, %v1433_v2  }
  0x35   : > { %719 = vperm.xlu0 %1236, %v1433_v2  }
  0x38   : > { %1235 = vset.pattern.permute.xlu1 %v1338_v30 }
  0x39   : > { %711 = vperm.xlu1 %1235, %v1439_v3   ;;  %1239 = vset.pattern.permute.xlu0 %v1339_v31 }
  0x3a   : > { %1141 = vmatpush3.bf16.xpose.msk.msra.mxu0 %vm1449_vm1, %v1060_v18  ;;  %743 = vperm.xlu0 %1239, %v1433_v2  }
  0x3b   : > { %1144 = vmatprep.subr.msk.bf16.mxu0 %vm1449_vm1, %v1069_v19 }
  0x3d   : > { %1237 = vset.pattern.permute.xlu1 %v1339_v31 }
  0x3e   : > { %735 = vperm.xlu1 %1237, %v1439_v3  }
  0x42   : > { %1147 = vmatpush3.bf16.xpose.msk.msra.mxu0 %vm1449_vm1, %v1061_v20  ;;  %739 = vperm.xlu1 %1237, %v1462_v6  }
  0x43   : > { %1150 = vmatprep.subr.msk.bf16.mxu0 %vm1449_vm1, %v1070_v21 }
  0x46   : > { %1238 = vset.pattern.permute.xlu1 %v1338_v30 }
  0x47   : > { %723 = vperm.xlu1 %1238, %v1444_v4  }
  0x4a   : > { %1153 = vmatpush3.bf16.xpose.msk.msra.mxu0 %vm1449_vm1, %v1062_v22 }
  0x4b   : > { %1156 = vmatprep.subr.msk.bf16.mxu0 %vm1449_vm1, %v1071_v23  ;;  %1240 = vset.pattern.permute.xlu1 %v1339_v31 }
  0x4c   : > { %747 = vperm.xlu1 %1240, %v1444_v4  }
  0x52   : > { %1159 = vmatpush3.bf16.xpose.msk.msra.mxu0 %vm1449_vm1, %v1063_v24 }
  0x59   : > { %1105 = vmatmul.mubr.msk.f32.vlgmr.msra.gmra.mrb[0].mxu0 %vm318_vm0, %v1426_v0 }
  0x5a   : > { %1106 = vmatprep.mubr.msk.f32.mxu0 %vm318_vm0, %v295_v25 }
  0x5d   : > { %1107 = vmatmul.mubr.msk.f32.gmra.mrb[2].mxu0 %vm318_vm0, %v295_v25 }
  0x5e   : > { %1108 = vmatprep.mubr.msk.f32.mxu0 %vm318_vm0, %v296_v26 }
  0x61   : > { %1109 = vmatmul.mubr.msk.f32.gmra.mrb[4].mxu0 %vm318_vm0, %v296_v26 }
  0x62   : > { %1110 = vmatprep.mubr.msk.f32.mxu0 %vm318_vm0, %v297_v27 }
  0x65   : > { %1111 = vmatmul.mubr.msk.f32.gmra.mrb[6].mxu0 %vm318_vm0, %v297_v27 }
  0x8e   : > { %v311_v32 = vpop.permute.xlu1 %310 }
  0x8f   : > { %v301_v34 = vpop.permute.xlu0 %300 }
  0x92   : > { %v316_v33 = vpop.permute.xlu1 %315 }
  0x93   : > { %v306_v36 = vpop.permute.xlu0 %305 }
  0x97   : > { %v522_v35 = vpop.permute.xlu1 %521 }
  0x98   : > { %v518_v42 = vpop.permute.xlu0 %517 }
  0x9c   : > { %v550_v37 = vpop.permute.xlu1 %549 }
  0x9d   : > { %v554_v50 = vpop.permute.xlu0 %553 }
  0xa1   : > { %v526_v45 = vpop.permute.xlu1 %525 }
  0xa2   : > { %v558_v7 = vpop.permute.xlu0 %557 }
  0xa5   : > { %v530_v63 = vpop.permute.xlu1 %529 }
  0xaa   : > { %v562_v15 = vpop.permute.xlu1 %561 }
 0x12c   : > { %v493_v38 = vpop.f32.mrb[0].mxu0 }
 0x12d   : > { %v494_v39 = vadd.f32 %v493_v38, %v301_v34  ;;  %v495_v40 = vpop.f32.mrb[1].mxu0  ;;  %v1340_v38 = vmov 6  }
 0x12e   : > { %v496_v41 = vadd.f32 %v495_v40, %v301_v34  ;;  %v580_v34 = vld [vmem:[%s1627_s2] sm:$0xff]  ;;  %1241 = vset.pattern.permute.xlu1 %v1340_v38  ;;  %v1342_v40 = vmov 7  }
 0x12f   : > { %v540_v43 = vmax.f32 %v494_v39, 0.0  ;;  %v532_v56 = vmul.f32 %v518_v42, %v494_v39  ;;  %v1341_v39 = vmov 8   ;;  %760 = vperm.xlu1 %1241, %v1439_v3  }
 0x130   : > { %v541_v44 = vmax.f32 %v496_v41, 0.0  ;;  %v499_v46 = vpop.f32.mrb[2].mxu0  ;;  %v533_v61 = vmul.f32 %v518_v42, %v496_v41  ;;  %1242 = vset.pattern.permute.xlu0 %v1341_v39  ;;  %v590_v41 = vpop.permute.xlu1 %589 }
 0x131   : > { %v500_v47 = vadd.f32 %v499_v46, %v306_v36  ;;  %v501_v48 = vpop.f32.mrb[3].mxu0  ;;  %v564_v51 = vmul.f32 %v550_v37, %v540_v43  ;;  %850 = vperm.xlu0 %1242, %v1439_v3   ;;  %v586_v42 = vpop.permute.xlu0 %585 }
 0x132   : > { %v502_v49 = vadd.f32 %v501_v48, %v306_v36  ;;  %v565_v55 = vmul.f32 %v550_v37, %v541_v44  ;;  %v582_v36 = vld [vmem:[%s1627_s2 + $0x10] sm:$0xff]  ;;  %v583_v37 = vld [vmem:[%s1627_s2 + $0x18] sm:$0xff] }
 0x133   : > { %v542_v52 = vmax.f32 %v500_v47, 0.0  ;;  %v534_v57 = vmul.f32 %v522_v35, %v500_v47  ;;  %v572_v4 = vadd.f32 %v564_v51, %v532_v56  ;;  %1243 = vset.pattern.permute.xlu1 %v1342_v40 }
 0x134   : > { %v543_v53 = vmax.f32 %v502_v49, 0.0  ;;  %v505_v54 = vpop.f32.mrb[4].mxu0  ;;  %v535_v62 = vmul.f32 %v522_v35, %v502_v49  ;;  %v573_v9 = vadd.f32 %v565_v55, %v533_v61  ;;  %v581_v35 = vld [vmem:[%s1627_s2 + $0x8] sm:$0xff]  ;;  %856 = vperm.xlu1 %1243, %v1439_v3   ;;  %v594_v43 = vpop.permute.xlu1 %593 }
 0x135   : > { %v566_v58 = vmul.f32 %v554_v50, %v542_v52  ;;  %v506_v59 = vadd.f32 %v505_v54, %v311_v32  ;;  %v507_v60 = vpop.f32.mrb[5].mxu0  ;;  %1244 = vset.pattern.permute.xlu0 %v1342_v40  ;;  %v598_v52 = vpop.permute.xlu0 %597 }
 0x136   : > { %v567_v0 = vmul.f32 %v554_v50, %v543_v53  ;;  %v508_v1 = vadd.f32 %v507_v60, %v311_v32 }
 0x137   : > { %v544_v2 = vmax.f32 %v506_v59, 0.0  ;;  %v574_v5 = vadd.f32 %v566_v58, %v534_v57  ;;  %v536_v21 = vmul.f32 %v526_v45, %v506_v59 }
 0x138   : > { %v545_v6 = vmax.f32 %v508_v1, 0.0  ;;  %v511_v8 = vpop.f32.mrb[6].mxu0  ;;  %v575_v10 = vadd.f32 %v567_v0, %v535_v62  ;;  %v537_v24 = vmul.f32 %v526_v45, %v508_v1  ;;  %v712_v47 = vpop.permute.xlu1 %711 }
 0x139   : > { %v512_v11 = vadd.f32 %v511_v8, %v316_v33  ;;  %v513_v12 = vpop.f32.mrb[7].mxu0  ;;  %v1162_v13 = vpack.c.bf16 %v574_v5, %v572_v4  ;;  %v568_v17 = vmul.f32 %v558_v7, %v544_v2  ;;  %v716_v61 = vpop.permute.xlu0 %715 }
 0x13a   : > { %v514_v14 = vadd.f32 %v513_v12, %v316_v33  ;;  %v1160_v16 = vpack.c.bf16 %v575_v10, %v573_v9  ;;  %v569_v19 = vmul.f32 %v558_v7, %v545_v6 }
 0x13b   : > { %v546_v18 = vmax.f32 %v512_v11, 0.0  ;;  %v538_v22 = vmul.f32 %v530_v63, %v512_v11  ;;  %v576_v27 = vadd.f32 %v568_v17, %v536_v21 }
 0x13c   : > { %v547_v20 = vmax.f32 %v514_v14, 0.0  ;;  %1161 = vmatprep.subr.bf16.mxu1 %v1160_v16  ;;  %v539_v25 = vmul.f32 %v530_v63, %v514_v14  ;;  %v577_v30 = vadd.f32 %v569_v19, %v537_v24  ;;  %v736_v55 = vpop.permute.xlu1 %735 }
 0x13d   : > { %v570_v23 = vmul.f32 %v562_v15, %v546_v18  ;;  %1163 = vmatpush1.bf16.msra.mxu1 %v1162_v13  ;;  %v720_v8 = vpop.permute.xlu0 %719 }
 0x13e   : > { %v571_v26 = vmul.f32 %v562_v15, %v547_v20 }
 0x13f   : > { %v578_v29 = vadd.f32 %v570_v23, %v538_v22 }
 0x140   : > { %v579_v31 = vadd.f32 %v571_v26, %v539_v25  ;;  %v740_v0 = vpop.permute.xlu1 %739 }
 0x141   : > { %v1166_v32 = vpack.c.bf16 %v578_v29, %v576_v27  ;;  %v744_v21 = vpop.permute.xlu0 %743 }
 0x142   : > { %v1164_v33 = vpack.c.bf16 %v579_v31, %v577_v30 }
 0x144   : > { %1165 = vmatprep.subr.bf16.mxu1 %v1164_v33  ;;  %v724_v9 = vpop.permute.xlu1 %723  ;;  %v758_v33 = vld [vmem:[%s1628_s3] sm:$0xff] }
 0x145   : > { %1167 = vmatpush1.bf16.msra.mxu1 %v1166_v32 }
 0x148   : > { %980 = vmatmul.mubr.msk.f32.vlgmr.msra.gmra.mrb[0].mxu1 %vm600_vm2, %v580_v34  ;;  %v748_v22 = vpop.permute.xlu1 %747 }
 0x149   : > { %683 = vmatprep.mubr.f32.mxu1 %v1336_v28 }
 0x14c   : > { %981 = vmatmul.mubr.msk.f32.gmra.mrb[2].mxu1 %vm600_vm2, %v581_v35 }
 0x14d   : > { %689 = vmatprep.mubr.f32.mxu1 %v1336_v28 }
 0x150   : > { %982 = vmatmul.mubr.msk.f32.gmra.mrb[4].mxu1 %vm600_vm2, %v582_v36 }
 0x151   : > { %695 = vmatprep.mubr.f32.mxu1 %v1336_v28 }
 0x154   : > { %983 = vmatmul.mubr.msk.f32.gmra.mrb[6].mxu1 %vm600_vm2, %v583_v37 }
 0x155   : > { %830 = vmatprep.mubr.f32.mxu1 %v1336_v28 }
 0x1ae   : > { %v761_v34 = vpop.permute.xlu1 %760 }
 0x21b   : > { %v679_v44 = vpop.f32.mrb[0].mxu1 }
 0x21c   : > { %v680_v45 = vadd.f32 %v679_v44, %v586_v42  ;;  %v681_v46 = vpop.f32.mrb[1].mxu1 }
 0x21d   : > { %v682_v28 = vadd.f32 %v681_v46, %v586_v42 }
 0x21e   : > { %1245 = vtanh.f32 %v680_v45  ;;  %v851_v45 = vpop.permute.xlu0 %850 }
 0x21f   : > { %1247 = vtanh.f32 %v682_v28  ;;  %v685_v48 = vpop.f32.mrb[2].mxu1  ;;  %v857_v28 = vpop.permute.xlu1 %856 }
 0x220   : > { %v686_v49 = vadd.f32 %v685_v48, %v590_v41  ;;  %v687_v50 = vpop.f32.mrb[3].mxu1 }
 0x221   : > { %v688_v51 = vadd.f32 %v687_v50, %v590_v41 }
 0x222   : > { %1249 = vtanh.f32 %v686_v49 }
 0x223   : > { %1251 = vtanh.f32 %v688_v51  ;;  %v691_v53 = vpop.f32.mrb[4].mxu1 }
 0x224   : > { %v692_v54 = vadd.f32 %v691_v53, %v594_v43  ;;  %v693_v3 = vpop.f32.mrb[5].mxu1 }
 0x225   : > { %v694_v56 = vadd.f32 %v693_v3, %v594_v43 }
 0x226   : > { %1253 = vtanh.f32 %v692_v54 }
 0x227   : > { %1255 = vtanh.f32 %v694_v56  ;;  %v697_v57 = vpop.f32.mrb[6].mxu1 }
 0x228   : > { %v1246_v58 = vpop.eup %1245  ;;  %v698_v59 = vadd.f32 %v697_v57, %v598_v52  ;;  %v699_v60 = vpop.f32.mrb[7].mxu1 }
 0x229   : > { %v1248_v62 = vpop.eup %1247  ;;  %v700_v63 = vadd.f32 %v699_v60, %v598_v52  ;;  %v726_v1 = vmul.f32 %v1246_v58, %v712_v47 }
 0x22a   : > { %1257 = vtanh.f32 %v698_v59  ;;  %v727_v4 = vmul.f32 %v1248_v62, %v712_v47 }
 0x22b   : > { %1259 = vtanh.f32 %v700_v63  ;;  %v750_v10 = vadd.f32 %v736_v55, %v726_v1 }
 0x22c   : > { %v1250_v2 = vpop.eup %1249  ;;  %v751_v13 = vadd.f32 %v736_v55, %v727_v4 }
 0x22d   : > { %v1252_v5 = vpop.eup %1251  ;;  %v728_v6 = vmul.f32 %v1250_v2, %v716_v61 }
 0x22e   : > { %v729_v7 = vmul.f32 %v1252_v5, %v716_v61 }
 0x22f   : > { %v752_v11 = vadd.f32 %v740_v0, %v728_v6 }
 0x230   : > { %v1254_v12 = vpop.eup %1253  ;;  %v753_v14 = vadd.f32 %v740_v0, %v729_v7 }
 0x231   : > { %v1256_v15 = vpop.eup %1255  ;;  %v1170_v16 = vpack.c.bf16 %v752_v11, %v750_v10  ;;  %v730_v18 = vmul.f32 %v1254_v12, %v720_v8 }
 0x232   : > { %v1168_v17 = vpack.c.bf16 %v753_v14, %v751_v13  ;;  %v731_v20 = vmul.f32 %v1256_v15, %v720_v8 }
 0x233   : > { %v754_v26 = vadd.f32 %v744_v21, %v730_v18 }
 0x234   : > { %v1258_v19 = vpop.eup %1257  ;;  %1169 = vmatprep.subr.bf16.mxu1 %v1168_v17  ;;  %v755_v29 = vadd.f32 %v744_v21, %v731_v20 }
 0x235   : > { %v1260_v23 = vpop.eup %1259  ;;  %v732_v24 = vmul.f32 %v1258_v19, %v724_v9  ;;  %1171 = vmatpush1.bf16.msra.mxu1 %v1170_v16 }
 0x236   : > { %v733_v25 = vmul.f32 %v1260_v23, %v724_v9 }
 0x237   : > { %v756_v27 = vadd.f32 %v748_v22, %v732_v24 }
 0x238   : > { %v757_v30 = vadd.f32 %v748_v22, %v733_v25 }
 0x239   : > { %v1174_v31 = vpack.c.bf16 %v756_v27, %v754_v26 }
 0x23a   : > { %v1172_v32 = vpack.c.bf16 %v757_v30, %v755_v29 }
 0x23c   : > { %1173 = vmatprep.subr.bf16.mxu1 %v1172_v32 }
 0x23d   : > { %1175 = vmatpush1.bf16.msra.mxu1 %v1174_v31 }
 0x240   : > { %984 = vmatmul.mubr.msk.f32.vlgmr.msra.gmra.mrb[8].mxu1 %vm600_vm2, %v758_v33 }
 0x313   : > { %v832_v35 = vpop.f32.mrb[8].mxu1 }
 0x314   : > { %v833_v36 = vadd.f32 %v832_v35, %v761_v34  ;;  %v834_v37 = vpop.f32.mrb[9].mxu1 }
 0x315   : > { %v835_v38 = vadd.f32 %v834_v37, %v761_v34 }
 0x316   : > { %v985_v39 = vmul.f32 -1.442695, %v833_v36 }
 0x317   : > { %v986_v40 = vmul.f32 -1.442695, %v835_v38 }
 0x318   : > { %1261 = vpow2.f32 %v985_v39 }
 0x319   : > { %1263 = vpow2.f32 %v986_v40 }
 0x322   : > { %v1262_v41 = vpop.eup %1261 }
 0x323   : > { %v1264_v42 = vpop.eup %1263  ;;  %v843_v43 = vadd.f32 1.0, %v1262_v41 }
 0x324   : > { %v844_v44 = vadd.f32 1.0, %v1264_v42 }
 0x325   : > { %1265 = vrcp.f32 %v843_v43 }
 0x326   : > { %1267 = vrcp.f32 %v844_v44 }
 0x32f   : > { %v1266_v46 = vpop.eup %1265 }
 0x330   : > { %v1268_v47 = vpop.eup %1267  ;;  %v853_v48 = vmul.f32 %v1266_v46, %v851_v45 }
 0x331   : > { %v854_v49 = vmul.f32 %v1268_v47, %v851_v45 }
 0x332   : > { %v859_v50 = vadd.f32 %v857_v28, %v853_v48 }
 0x333   : > { %v860_v51 = vadd.f32 %v857_v28, %v854_v49 }
 0x334   : > { %861 = vst [vmem:[%s218_s7] sm:$0xff] %v859_v50 }
 0x335   : > { %862 = vst [vmem:[%s218_s7 + $0x8] sm:$0xff] %v860_v51 }
 0x336   : > { %1282 = shalt.err (!%p1279_p3)
}
 0x337   : > { %s1283_s16 = scalar_lea.hbm %s1583_s11, 256  ;;  %s1287_s25 = scalar_lea.hbm %s1630_s5, 512 }
 0x338   : > { %p1284_p4 = scmp.ne.s32.totalorder %s1583_s11, %s1283_s16  ;;  %p1288_p9 = scmp.lt.u32.totalorder %s1583_s11, %s1630_s5 }
 0x339   : > { %p1289_p10 = scmp.lt.u32.totalorder %s1287_s25, %s1283_s16  ;;  %p1291_p12 = scmp.lt.u32.totalorder %s1283_s16, %s1583_s11 }
 0x33a   : > { %p1285_p7 = pnand %p1284_p4, %p1412_p5 }
 0x33b   : > { %p1290_p11 = por %p1289_p10, %p1288_p9 }
 0x33c   : > { %p1286_p8 = pneg %p1285_p7 }
 0x33d   : > { %p1292_p13 = por %p1291_p12, %p1290_p11 }
 0x33f   : > { %p1293_p0 = pnand %p1292_p13, %p1286_p8 }
 0x341   : > { %1296 = shalt.err (!%p1293_p0)
}
 0x342   : > { %1176 = dma.vmem_to_hbm [thread:$0]  (%p1412_p5), %s1585_s8, 256, %s1583_s11, %s864_s12  }
 0x343 PF: > { %p1182_p1 = scmp.ge.s32.totalorder %s1331_s21, 2  ;;  %s890_s6 = sand.u32 1, %s1319_s18  }
 0x344   : > { %s891_s7 = scalar_lea.sflag [#allocation3], %s890_s6 }
 0x345   : > { %p1179_p2 = pnand %p1182_p1, %p1416_p6 }
 0x347   : > { %1314 = dma.done.wait (!%p1179_p2), %s891_s7, 256  }
 0x348   : > { %1316 = vsyncadd (!%p1179_p2), %s891_s7, 4294967040  ;;  %p15_p3 = scmp.ge.s32.totalorder %s1399_s24, 4   ;;  %s1635_s18 = smov %s1323_s19 }
 0x349   : > { %s1636_s19 = smov %s1327_s20  ;;  %s1637_s20 = smov %s1410_s27 }
 0x34a   : > { %s1638_s21 = smov %s1399_s24  ;;  %17 = sbr.rel (!%p15_p3) target bundleno = 3 (0x3), region = 75 }
 0x351   :  { %896 = vsyncpa [#allocation3], 1 }
 0x352   :  { %898 = vsyncpa [#allocation3 + $0x1], 1 }

</bundles_post_ra>
